<compile_context>
chip_gen: v7x
topology: tpu7x:2x2x1
jax: 0.10.0
libtpu: 0.0.40
codegen_flags: <defaults>
</compile_context>

<pallas_src>
import functools

import jax
import jax.numpy as jnp
from jax.experimental import pallas as pl
from jax.experimental.pallas import tpu as pltpu


def _round_up(x, m):
    return ((x + m - 1) // m) * m


def _choose_tile_n(n):
    """Node-tile heuristic (always a multiple of 8)."""
    if n <= 1024:
        return _round_up(n, 8)                 # single tile for small graphs
    if n <= 8192:
        return _round_up(pl.cdiv(n, 2), 8)     # >= 2 tiles -> v7x megacore
    return 4096                                # amortize per-step overhead


# ----------------------------- fused Pallas kernel ---------------------------


def _fused_sign_kernel(x_ref, w0_ref, b0_ref, *rest, compute_dtype):
    """Per-scale linears (block-diag matmul) + ReLU + full MLP for one node tile.

    x_ref:  (TILE_N, S*Cin)   lane-dense bf16 node features (scales pre-concat)
    w0_ref: (S*Cin, S*H)      block-diagonal stack of per-scale weights (bf16)
    b0_ref: (1, S*H)          concatenated per-scale biases (f32)
    rest:   (w_1, b_1, ..., w_L, b_L, out_ref)   MLP layers + output ref
    """
    out_ref = rest[-1]
    mlp_refs = rest[:-1]
    n_mlp = len(mlp_refs) // 2

    # One K = S*Cin contraction reproduces torch.cat([Linear_s(x_s)], dim=1).
    h = jnp.dot(x_ref[...], w0_ref[...], preferred_element_type=jnp.float32)
    # relu(cat(h_s)) == cat(relu(h_s)); dropout=0.0 -> identity.
    h = jnp.maximum(h + b0_ref[...], 0.0)      # keep elementwise in f32 (v5e)

    # MLP: hidden layers with ReLU, final layer without. All intermediates stay
    # in registers/VMEM; only the final (TILE_N, out_channels) tile is stored.
    for li in range(n_mlp):
        w = mlp_refs[2 * li][...]
        b = mlp_refs[2 * li + 1][...]
        h = jnp.dot(h.astype(compute_dtype), w,
                    preferred_element_type=jnp.float32) + b
        if li < n_mlp - 1:
            h = jnp.maximum(h, 0.0)

    out_ref[...] = h.astype(out_ref.dtype)


def sign_forward(x_cat, w0_block, b0_cat, mlp_params, *, out_channels,
                 compute_dtype=jnp.bfloat16, tile_n=None):
    """Fused SIGN forward on a lane-dense (N, S*Cin) bf16 feature matrix."""
    N, K0 = x_cat.shape
    _, H_total = w0_block.shape

    if tile_n is None:
        tile_n = _choose_tile_n(N)
    # Respect the (8,128) BlockSpec rule; never exceed one padded-N tile.
    tile_n = _round_up(min(tile_n, _round_up(N, 8)), 8)

    grid = (pl.cdiv(N, tile_n),)

    in_specs = [
        pl.BlockSpec((tile_n, K0), lambda i: (i, 0)),      # node tile (bf16)
        pl.BlockSpec((K0, H_total), lambda i: (0, 0)),     # block-diag W0
        pl.BlockSpec((1, H_total), lambda i: (0, 0)),      # concatenated b0
    ]
    flat_mlp = []
    for (w, b) in mlp_params:
        in_specs.append(pl.BlockSpec(w.shape, lambda i: (0, 0)))
        in_specs.append(pl.BlockSpec(b.shape, lambda i: (0, 0)))
        flat_mlp.extend([w, b])

    # Advisory cost hint: the kernel is HBM-read / per-step-overhead bound.
    matmul_cols = K0 * H_total + sum(int(w.shape[0]) * int(w.shape[1])
                                     for w, _ in mlp_params)
    flops = 2 * N * matmul_cols
    bytes_accessed = (
        x_cat.size * x_cat.dtype.itemsize
        + w0_block.size * w0_block.dtype.itemsize
        + b0_cat.size * b0_cat.dtype.itemsize
        + sum(w.size * w.dtype.itemsize + b.size * b.dtype.itemsize
              for w, b in mlp_params)
        + N * out_channels * 4)

    kern = functools.partial(_fused_sign_kernel, compute_dtype=compute_dtype)

    return pl.pallas_call(
        kern,
        out_shape=jax.ShapeDtypeStruct((N, out_channels), jnp.float32),
        grid=grid,
        in_specs=in_specs,
        out_specs=pl.BlockSpec((tile_n, out_channels), lambda i: (i, 0)),
        compiler_params=pltpu.CompilerParams(
            dimension_semantics=("parallel",)),       # node tiles independent
        cost_estimate=pl.CostEstimate(
            flops=int(flops), transcendentals=0,
            bytes_accessed=int(bytes_accessed)),
    )(x_cat, w0_block, b0_cat, *flat_mlp)


# --------------------------- parameter construction --------------------------


def _init_linear(key, fan_in, fan_out):
    """Deterministic init mimicking torch.nn.Linear (uniform +/- 1/sqrt(fan_in))."""
    kw, kb = jax.random.split(key)
    bound = 1.0 / (fan_in ** 0.5)
    w = jax.random.uniform(kw, (fan_in, fan_out), jnp.float32, -bound, bound)
    b = jax.random.uniform(kb, (1, fan_out), jnp.float32, -bound, bound)
    return w, b


class OriginalSIGNPallas:
    """JAX/Pallas port of Original_SIGN (batch_norm=False, dropout=0, eval mode).

    NOTE: weights (and the matmul inputs) are kept in bf16 for the MXU, so
    outputs match an f32 torch reference only to bf16-matmul tolerance.
    """

    def __init__(self, key, single_scale_hidden_channels, MLP_hidden_channels,
                 MLP_num_layers, single_scale_in_channels, num_scales,
                 out_channels, batch_norm=False, dropout=0.0, drop_input=False,
                 compute_dtype=jnp.bfloat16):
        assert not batch_norm, "TODO(synk): batch_norm=True not implemented"
        assert dropout == 0.0 and not drop_input, (
            "TODO(synk): training-mode dropout not implemented")
        self.num_scales = num_scales
        self.single_scale_in_channels = single_scale_in_channels
        self.out_channels = out_channels
        self.compute_dtype = compute_dtype
        keys = jax.random.split(key, num_scales + MLP_num_layers)

        Cin = single_scale_in_channels
        H = single_scale_hidden_channels

        # Per-scale Linear(Cin -> H) folded into one block-diagonal weight so
        # the S matmuls become a single K = S*Cin contraction on the MXU
        # (ideal at S=2 / K=128; see module-level TODO for S >= 4).
        w_block = jnp.zeros((num_scales * Cin, num_scales * H), jnp.float32)
        b_parts = []
        for s in range(num_scales):
            w, b = _init_linear(keys[s], Cin, H)
            w_block = w_block.at[s * Cin:(s + 1) * Cin,
                                 s * H:(s + 1) * H].set(w)
            b_parts.append(b)
        self.w0 = w_block.astype(compute_dtype)          # (S*Cin, S*H) bf16
        self.b0 = jnp.concatenate(b_parts, axis=-1)      # (1, S*H) f32

        # MLP: in = num_scales * single_scale_hidden.
        mlp_dims = ([num_scales * H]
                    + [MLP_hidden_channels] * (MLP_num_layers - 1)
                    + [out_channels])
        self.mlp_params = []
        for li in range(MLP_num_layers):
            w, b = _init_linear(keys[num_scales + li],
                                mlp_dims[li], mlp_dims[li + 1])
            self.mlp_params.append((w.astype(compute_dtype), b))

    def _prep_input(self, x_scales):
        # (S, N, Cin) -> lane-dense (N, S*Cin) bf16. Free layout plumbing in
        # the wrapper; halves the kernel's dominant HBM input stream and feeds
        # the block-diagonal matmul directly (no in-kernel concat).
        S, N, Cin = x_scales.shape
        x_cat = jnp.transpose(x_scales, (1, 0, 2)).reshape(N, S * Cin)
        return x_cat.astype(self.compute_dtype)

    def __call__(self, x_scales, tile_n=None):
        assert x_scales.shape[0] == self.num_scales
        x_cat = self._prep_input(x_scales)
        return sign_forward(x_cat, self.w0, self.b0, self.mlp_params,
                            out_channels=self.out_channels,
                            compute_dtype=self.compute_dtype, tile_n=tile_n)

    # Pure-JAX reference (same bf16-rounded weights/inputs, f32 accumulation).
    def reference(self, x_scales):
        x = self._prep_input(x_scales).astype(jnp.float32)
        h = jnp.dot(x, self.w0.astype(jnp.float32),
                    precision=jax.lax.Precision.HIGHEST) + self.b0
        h = jnp.maximum(h, 0.0)
        n_layers = len(self.mlp_params)
        for li, (w, b) in enumerate(self.mlp_params):
            h = h.astype(self.compute_dtype).astype(jnp.float32)
            h = jnp.dot(h, w.astype(jnp.float32),
                        precision=jax.lax.Precision.HIGHEST) + b
            if li < n_layers - 1:
                h = jnp.maximum(h, 0.0)
        return h


# ---------------------------------- main -------------------------------------

if __name__ == "__main__":
    num_scales = 2
    N = 16                           # number of nodes
    single_scale_in_channels = 64
    single_scale_hidden_channels = 128
    MLP_hidden_channels = 128
    MLP_num_layers = 3
    out_channels = 16

    key = jax.random.PRNGKey(0)
    k_in, k_params = jax.random.split(key)

    x_scales = jax.random.normal(
        k_in, (num_scales, N, single_scale_in_channels), jnp.float32)

    model = OriginalSIGNPallas(
        k_params,
        single_scale_hidden_channels=single_scale_hidden_channels,
        MLP_hidden_channels=MLP_hidden_channels,
        MLP_num_layers=MLP_num_layers,
        single_scale_in_channels=single_scale_in_channels,
        num_scales=num_scales,
        out_channels=out_channels,
    )

    out = model(x_scales)
    out = jax.block_until_ready(out)
    assert out.shape == (N, out_channels), out.shape

    # Loose sanity check against a pure-JAX reference (bf16 matmul inputs).
    ref = jax.block_until_ready(model.reference(x_scales))
    assert jnp.allclose(out, ref, rtol=5e-2, atol=1e-1), (
        float(jnp.max(jnp.abs(out - ref))))

    print("KERNEL_OK")
</pallas_src>

<mosaic_0001>
module attributes {stable_mosaic.version = 11 : i64} {
  func.func @_fused_sign_kernel(%arg0: i32, %arg1: memref<16x128xbf16, #tpu.memory_space<vmem>>, %arg2: memref<128x256xbf16, #tpu.memory_space<vmem>>, %arg3: memref<1x256xf32, #tpu.memory_space<vmem>>, %arg4: memref<256x128xbf16, #tpu.memory_space<vmem>>, %arg5: memref<1x128xf32, #tpu.memory_space<vmem>>, %arg6: memref<128x128xbf16, #tpu.memory_space<vmem>>, %arg7: memref<1x128xf32, #tpu.memory_space<vmem>>, %arg8: memref<128x16xbf16, #tpu.memory_space<vmem>>, %arg9: memref<1x16xf32, #tpu.memory_space<vmem>>, %arg10: memref<16x16xf32, #tpu.memory_space<vmem>>) attributes {dimension_semantics = [#tpu.dimension_semantics<parallel>], iteration_bounds = array<i64: 1>, scalar_prefetch = 0 : i64, scratch_operands = 0 : i64, tpu.core_type = #tpu.core_type<tc>, window_params = [{transform_indices = @transform_0, window_bounds = array<i64: 16, 128>}, {pipeline_mode = #tpu.pipeline_mode<synchronous>, transform_indices = @transform_1, window_bounds = array<i64: 128, 256>}, {pipeline_mode = #tpu.pipeline_mode<synchronous>, transform_indices = @transform_2, window_bounds = array<i64: 1, 256>}, {pipeline_mode = #tpu.pipeline_mode<synchronous>, transform_indices = @transform_3, window_bounds = array<i64: 256, 128>}, {pipeline_mode = #tpu.pipeline_mode<synchronous>, transform_indices = @transform_4, window_bounds = array<i64: 1, 128>}, {pipeline_mode = #tpu.pipeline_mode<synchronous>, transform_indices = @transform_5, window_bounds = array<i64: 128, 128>}, {pipeline_mode = #tpu.pipeline_mode<synchronous>, transform_indices = @transform_6, window_bounds = array<i64: 1, 128>}, {pipeline_mode = #tpu.pipeline_mode<synchronous>, transform_indices = @transform_7, window_bounds = array<i64: 128, 16>}, {pipeline_mode = #tpu.pipeline_mode<synchronous>, transform_indices = @transform_8, window_bounds = array<i64: 1, 16>}, {transform_indices = @transform_9, window_bounds = array<i64: 16, 16>}]} {
    %c0 = arith.constant 0 : index
    %c0_0 = arith.constant 0 : index
    %0 = vector.load %arg1[%c0, %c0_0] : memref<16x128xbf16, #tpu.memory_space<vmem>>, vector<16x128xbf16>
    %c0_1 = arith.constant 0 : index
    %c0_2 = arith.constant 0 : index
    %1 = vector.load %arg2[%c0_1, %c0_2] : memref<128x256xbf16, #tpu.memory_space<vmem>>, vector<128x256xbf16>
    %cst = arith.constant dense<0.000000e+00> : vector<16x256xf32>
    %2 = tpu.matmul %0, %1, %cst {dimension_numbers = #tpu.dot_dimension_numbers<[1], [0], [0], [1], [0, 0, 1, 1], [], []>} : vector<16x128xbf16>, vector<128x256xbf16>, vector<16x256xf32> -> vector<16x256xf32>
    %c0_3 = arith.constant 0 : index
    %c0_4 = arith.constant 0 : index
    %3 = vector.load %arg3[%c0_3, %c0_4] : memref<1x256xf32, #tpu.memory_space<vmem>>, vector<1x256xf32>
    %4 = vector.broadcast %3 : vector<1x256xf32> to vector<16x256xf32>
    %5 = arith.addf %2, %4 : vector<16x256xf32>
    %cst_5 = arith.constant 0.000000e+00 : f32
    %6 = vector.broadcast %cst_5 : f32 to vector<16x256xf32>
    %7 = arith.maximumf %5, %6 : vector<16x256xf32>
    %c0_6 = arith.constant 0 : index
    %c0_7 = arith.constant 0 : index
    %8 = vector.load %arg4[%c0_6, %c0_7] : memref<256x128xbf16, #tpu.memory_space<vmem>>, vector<256x128xbf16>
    %c0_8 = arith.constant 0 : index
    %c0_9 = arith.constant 0 : index
    %9 = vector.load %arg5[%c0_8, %c0_9] : memref<1x128xf32, #tpu.memory_space<vmem>>, vector<1x128xf32>
    %10 = arith.truncf %7 : vector<16x256xf32> to vector<16x256xbf16>
    %cst_10 = arith.constant dense<0.000000e+00> : vector<16x128xf32>
    %11 = tpu.matmul %10, %8, %cst_10 {dimension_numbers = #tpu.dot_dimension_numbers<[1], [0], [0], [1], [0, 0, 1, 1], [], []>} : vector<16x256xbf16>, vector<256x128xbf16>, vector<16x128xf32> -> vector<16x128xf32>
    %12 = vector.broadcast %9 : vector<1x128xf32> to vector<16x128xf32>
    %13 = arith.addf %11, %12 : vector<16x128xf32>
    %cst_11 = arith.constant 0.000000e+00 : f32
    %14 = vector.broadcast %cst_11 : f32 to vector<16x128xf32>
    %15 = arith.maximumf %13, %14 : vector<16x128xf32>
    %c0_12 = arith.constant 0 : index
    %c0_13 = arith.constant 0 : index
    %16 = vector.load %arg6[%c0_12, %c0_13] : memref<128x128xbf16, #tpu.memory_space<vmem>>, vector<128x128xbf16>
    %c0_14 = arith.constant 0 : index
    %c0_15 = arith.constant 0 : index
    %17 = vector.load %arg7[%c0_14, %c0_15] : memref<1x128xf32, #tpu.memory_space<vmem>>, vector<1x128xf32>
    %18 = arith.truncf %15 : vector<16x128xf32> to vector<16x128xbf16>
    %cst_16 = arith.constant dense<0.000000e+00> : vector<16x128xf32>
    %19 = tpu.matmul %18, %16, %cst_16 {dimension_numbers = #tpu.dot_dimension_numbers<[1], [0], [0], [1], [0, 0, 1, 1], [], []>} : vector<16x128xbf16>, vector<128x128xbf16>, vector<16x128xf32> -> vector<16x128xf32>
    %20 = vector.broadcast %17 : vector<1x128xf32> to vector<16x128xf32>
    %21 = arith.addf %19, %20 : vector<16x128xf32>
    %cst_17 = arith.constant 0.000000e+00 : f32
    %22 = vector.broadcast %cst_17 : f32 to vector<16x128xf32>
    %23 = arith.maximumf %21, %22 : vector<16x128xf32>
    %c0_18 = arith.constant 0 : index
    %c0_19 = arith.constant 0 : index
    %24 = vector.load %arg8[%c0_18, %c0_19] : memref<128x16xbf16, #tpu.memory_space<vmem>>, vector<128x16xbf16>
    %c0_20 = arith.constant 0 : index
    %c0_21 = arith.constant 0 : index
    %25 = vector.load %arg9[%c0_20, %c0_21] : memref<1x16xf32, #tpu.memory_space<vmem>>, vector<1x16xf32>
    %26 = arith.truncf %23 : vector<16x128xf32> to vector<16x128xbf16>
    %cst_22 = arith.constant dense<0.000000e+00> : vector<16x16xf32>
    %27 = tpu.matmul %26, %24, %cst_22 {dimension_numbers = #tpu.dot_dimension_numbers<[1], [0], [0], [1], [0, 0, 1, 1], [], []>} : vector<16x128xbf16>, vector<128x16xbf16>, vector<16x16xf32> -> vector<16x16xf32>
    %28 = vector.broadcast %25 : vector<1x16xf32> to vector<16x16xf32>
    %29 = arith.addf %27, %28 : vector<16x16xf32>
    %c0_23 = arith.constant 0 : index
    %c0_24 = arith.constant 0 : index
    %30 = vector.load %arg10[%c0_23, %c0_24] : memref<16x16xf32, #tpu.memory_space<vmem>>, vector<16x16xf32>
    tpu.vector_store %arg10[%c0_23, %c0_24], %29 {strides = array<i32>} : memref<16x16xf32, #tpu.memory_space<vmem>>, vector<16x16xf32>,
    return
  }
  func.func @transform_0(%arg0: i32) -> (i32, i32) {
    %c0_i32 = arith.constant 0 : i32
    %c0_i32_0 = arith.constant 0 : i32
    return %arg0, %c0_i32 : i32, i32
  }
  func.func @transform_1(%arg0: i32) -> (i32, i32) {
    %c0_i32 = arith.constant 0 : i32
    %c0_i32_0 = arith.constant 0 : i32
    %c0_i32_1 = arith.constant 0 : i32
    return %c0_i32, %c0_i32_0 : i32, i32
  }
  func.func @transform_2(%arg0: i32) -> (i32, i32) {
    %c0_i32 = arith.constant 0 : i32
    %c0_i32_0 = arith.constant 0 : i32
    %c0_i32_1 = arith.constant 0 : i32
    return %c0_i32, %c0_i32_0 : i32, i32
  }
  func.func @transform_3(%arg0: i32) -> (i32, i32) {
    %c0_i32 = arith.constant 0 : i32
    %c0_i32_0 = arith.constant 0 : i32
    %c0_i32_1 = arith.constant 0 : i32
    return %c0_i32, %c0_i32_0 : i32, i32
  }
  func.func @transform_4(%arg0: i32) -> (i32, i32) {
    %c0_i32 = arith.constant 0 : i32
    %c0_i32_0 = arith.constant 0 : i32
    %c0_i32_1 = arith.constant 0 : i32
    return %c0_i32, %c0_i32_0 : i32, i32
  }
  func.func @transform_5(%arg0: i32) -> (i32, i32) {
    %c0_i32 = arith.constant 0 : i32
    %c0_i32_0 = arith.constant 0 : i32
    %c0_i32_1 = arith.constant 0 : i32
    return %c0_i32, %c0_i32_0 : i32, i32
  }
  func.func @transform_6(%arg0: i32) -> (i32, i32) {
    %c0_i32 = arith.constant 0 : i32
    %c0_i32_0 = arith.constant 0 : i32
    %c0_i32_1 = arith.constant 0 : i32
    return %c0_i32, %c0_i32_0 : i32, i32
  }
  func.func @transform_7(%arg0: i32) -> (i32, i32) {
    %c0_i32 = arith.constant 0 : i32
    %c0_i32_0 = arith.constant 0 : i32
    %c0_i32_1 = arith.constant 0 : i32
    return %c0_i32, %c0_i32_0 : i32, i32
  }
  func.func @transform_8(%arg0: i32) -> (i32, i32) {
    %c0_i32 = arith.constant 0 : i32
    %c0_i32_0 = arith.constant 0 : i32
    %c0_i32_1 = arith.constant 0 : i32
    return %c0_i32, %c0_i32_0 : i32, i32
  }
  func.func @transform_9(%arg0: i32) -> (i32, i32) {
    %c0_i32 = arith.constant 0 : i32
    %c0_i32_0 = arith.constant 0 : i32
    return %arg0, %c0_i32 : i32, i32
  }
}

</mosaic_0001>

<bundles_post_ra>
// kernel: tpu_custom_call.1
= control target key start
LH: loop header
LB: loop body
LE: loop exit
PB: predicated region body
PF: predicated region fallthrough
CT: control target
= control target key end

     0   :  { %14 = vsyncpa [#allocation3], 0  ;;  %s1108_s0 = inlined_call_operand.vmem [shape: bf16[16,128], index: 0, kind: input, shape index: {}]   ;;  %s1109_s1 = inlined_call_operand.hbm [shape: bf16[128,256], index: 1, kind: input, shape index: {}]   ;;  %s1110_s2 = inlined_call_operand.vmem [shape: f32[1,256], index: 2, kind: input, shape index: {}]   ;;  %s1111_s3 = inlined_call_operand.hbm [shape: bf16[256,128], index: 3, kind: input, shape index: {}]   ;;  %s1112_s4 = inlined_call_operand.vmem [shape: f32[1,128], index: 4, kind: input, shape index: {}]   ;;  %s1113_s5 = inlined_call_operand.vmem [shape: bf16[128,128], index: 5, kind: input, shape index: {}]   ;;  %s1114_s6 = inlined_call_operand.vmem [shape: f32[1,128], index: 6, kind: input, shape index: {}]   ;;  %s1115_s7 = inlined_call_operand.vmem [shape: bf16[128,16], index: 7, kind: input, shape index: {}]   ;;  %s1116_s8 = inlined_call_operand.vmem [shape: f32[1,16], index: 8, kind: input, shape index: {}]   ;;  %s1117_s9 = inlined_call_operand.hbm [shape: f32[16,16], index: 9, kind: output, shape index: {}]  }
   0x1   :  { %15 = vsyncpa [#allocation6], 0 }
   0x2   :  { %16 = vsyncpa [#allocation4], 0  ;;  %s925_s30 = smov [#allocation2]   ;;  %s853_s13 = scalar_lea.hbm %s1109_s1, 2048 }
   0x3   :  { %s24_s10 = sshll.u32 %s925_s30, 4  ;;  %p854_p0 = scmp.ne.s32.totalorder %s1109_s1, %s853_s13  ;;  %s25_s10 = int_to_ptr.vmem [resolvable:$true] %s24_s10 }
   0x4   :  { %p857_p1 = scmp.lt.u32.totalorder %s853_s13, %s1109_s1 }
   0x6   :  { %p859_p2 = pnand %p857_p1, %p854_p0 }
   0x8   :  { %862 = shalt.err (!%p859_p2)
}
   0x9   :  { %s863_s18 = scalar_lea.vmem %s25_s10, 2048  ;;  %p868_p4 = scmp.lt.s32.totalorder %s25_s10, %s25_s10 }
   0xa   :  { %p864_p3 = scmp.ne.s32.totalorder %s25_s10, %s863_s18  ;;  %p869_p5 = scmp.lt.s32.totalorder %s863_s18, %s863_s18 }
   0xc   :  { %p870_p6 = por %p869_p5, %p868_p4 }
   0xe   :  { %p871_p7 = pnand %p870_p6, %p864_p3 }
  0x10   :  { %874 = shalt.err (!%p871_p7)
}
  0x11   :  { %s926_s19 = smov 128   ;;  %s927_s20 = smov 8  }
  0x12   :  { %30 = dma.hbm_to_vmem [thread:$0]  %s1109_s1, 2048, %s25_s10, [#allocation3], %s926_s19, %s926_s19, %s927_s20  }
  0x13   :  { %s928_s23 = smov [#allocation5]   ;;  %s875_s27 = scalar_lea.hbm %s1111_s3, 2048 }
  0x14   :  { %s38_s24 = sshll.u32 %s928_s23, 4  ;;  %p876_p8 = scmp.ne.s32.totalorder %s1111_s3, %s875_s27  ;;  %s39_s24 = int_to_ptr.vmem [resolvable:$true] %s38_s24 }
  0x15   :  { %p879_p9 = scmp.lt.u32.totalorder %s875_s27, %s1111_s3 }
  0x17   :  { %p881_p10 = pnand %p879_p9, %p876_p8 }
  0x19   :  { %884 = shalt.err (!%p881_p10)
}
  0x1a   :  { %s885_s12 = scalar_lea.vmem %s39_s24, 2048  ;;  %p890_p12 = scmp.lt.s32.totalorder %s39_s24, %s39_s24 }
  0x1b   :  { %p886_p11 = scmp.ne.s32.totalorder %s39_s24, %s885_s12  ;;  %p891_p13 = scmp.lt.s32.totalorder %s885_s12, %s885_s12 }
  0x1d   :  { %p892_p0 = por %p891_p13, %p890_p12 }
  0x1f   :  { %p893_p1 = pnand %p892_p0, %p886_p11 }
  0x21   :  { %896 = shalt.err (!%p893_p1)
}
  0x22   :  { %s929_s1 = smov 64   ;;  %s930_s10 = smov 4  }
  0x23   :  { %44 = dma.hbm_to_vmem [thread:$0]  %s1111_s3, 2048, %s39_s24, [#allocation6], %s929_s1, %s929_s1, %s930_s10  }
  0x24   :  { %919 = dma.done.wait [#allocation3], 2048  }
  0x25   :  { %920 = vsyncadd [#allocation3], 4294965248 }
  0x26   :  { %921 = dma.done.wait [#allocation6], 2048  }
  0x27   :  { %922 = vsyncadd [#allocation6], 4294965248  ;;  %v931_v0 = vmov 0   ;;  %v796_v1 = vld [vmem:[#allocation2 + $0x4] ss:$8 sps:$4 sm:$0xff]   ;;  %v825_v16 = vld [vmem:[#allocation5 + $0x50] sm:$0xff]   ;;  %v82_v40 = vlaneseq }
  0x28   :  { %210 = vmatprep.mubr.bf16.mxu0 %v931_v0  ;;  %v798_v2 = vld [vmem:[#allocation2] ss:$8 sps:$4 sm:$0xff]   ;;  %178 = vmatprep.subr.bf16.mxu0 %v796_v1  ;;  %v799_v3 = vld [vmem:[#allocation2 + $0x14] ss:$8 sps:$4 sm:$0xff]   ;;  %v801_v4 = vld [vmem:[#allocation2 + $0x10] ss:$8 sps:$4 sm:$0xff]  }
  0x29   :  { %179 = vmatpush1.bf16.msra.mxu0 %v798_v2  ;;  %v802_v5 = vld [vmem:[#allocation2 + $0x24] ss:$8 sps:$4 sm:$0xff]   ;;  %v804_v6 = vld [vmem:[#allocation2 + $0x20] ss:$8 sps:$4 sm:$0xff]   ;;  %v805_v7 = vld [vmem:[#allocation2 + $0x34] ss:$8 sps:$4 sm:$0xff]  }
  0x2a   :  { %180 = vmatprep.subr.bf16.mxu0 %v799_v3  ;;  %v807_v8 = vld [vmem:[#allocation2 + $0x30] ss:$8 sps:$4 sm:$0xff]   ;;  %v808_v9 = vld [vmem:[#allocation2 + $0x44] ss:$8 sps:$4 sm:$0xff]   ;;  %v810_v11 = vld [vmem:[#allocation2 + $0x40] ss:$8 sps:$4 sm:$0xff]  }
  0x2b   :  { %v821_v10 = vld [vmem:[#allocation5 + $0x40] sm:$0xff]   ;;  %v811_v13 = vld [vmem:[#allocation2 + $0x54] ss:$8 sps:$4 sm:$0xff]   ;;  %v823_v14 = vld [vmem:[#allocation5 + $0x48] sm:$0xff]   ;;  %v932_v35 = vmov 0.0   ;;  %v83_v41 = vshrl.u32 %v82_v40, 7 }
  0x2c   :  { %v822_v12 = vld [vmem:[#allocation5] sm:$0xff]   ;;  %706 = vmatprep.subr.bf16.mxu1 %v821_v10  ;;  %v824_v15 = vld [vmem:[#allocation5 + $0x8] sm:$0xff]   ;;  %v813_v17 = vld [vmem:[#allocation2 + $0x50] ss:$8 sps:$4 sm:$0xff]   ;;  %vm933_vm0 = vmmov 0   ;;  %vm633_vm1 = vcmask 130048  }
  0x2d   :  { %181 = vmatpush1.bf16.msra.mxu0 %v801_v4  ;;  %707 = vmatpush3.bf16.msra.mxu1 %v822_v12  ;;  %v814_v18 = vld [vmem:[#allocation2 + $0x64] ss:$8 sps:$4 sm:$0xff]   ;;  %v826_v19 = vld [vmem:[#allocation5 + $0x10] sm:$0xff]   ;;  %v827_v20 = vld [vmem:[#allocation5 + $0x58] sm:$0xff]   ;;  %v84_v42 = vsub.s32 0, %v83_v41  ;;  %v88_v44 = vsub.s32 1, %v83_v41 }
  0x2e   :  { %182 = vmatprep.subr.bf16.mxu0 %v802_v5  ;;  %708 = vmatprep.subr.bf16.mxu1 %v823_v14  ;;  %v816_v21 = vld [vmem:[#allocation2 + $0x60] ss:$8 sps:$4 sm:$0xff]   ;;  %v817_v22 = vld [vmem:[#allocation2 + $0x74] ss:$8 sps:$4 sm:$0xff]   ;;  %v819_v25 = vld [vmem:[#allocation2 + $0x70] ss:$8 sps:$4 sm:$0xff]  }
  0x2f   :  { %v828_v23 = vld [vmem:[#allocation5 + $0x18] sm:$0xff]   ;;  %v829_v24 = vld [vmem:[#allocation5 + $0x60] sm:$0xff]   ;;  %v831_v27 = vld [vmem:[#allocation5 + $0x68] sm:$0xff]  }
  0x30   :  { %v830_v26 = vld [vmem:[#allocation5 + $0x20] sm:$0xff]   ;;  %v832_v29 = vld [vmem:[#allocation5 + $0x28] sm:$0xff]   ;;  %v833_v30 = vld [vmem:[#allocation5 + $0x70] sm:$0xff]  }
  0x31   :  { %183 = vmatpush1.bf16.msra.mxu0 %v804_v6  ;;  %709 = vmatpush3.bf16.msra.mxu1 %v824_v15  ;;  %v820_v28 = vld [vmem:[%s1108_s0] sm:$0xff]   ;;  %v834_v31 = vld [vmem:[#allocation5 + $0x30] sm:$0xff]   ;;  %v835_v32 = vld [vmem:[#allocation5 + $0x78] sm:$0xff]  }
  0x32   :  { %184 = vmatprep.subr.bf16.mxu0 %v805_v7  ;;  %710 = vmatprep.subr.bf16.mxu1 %v825_v16  ;;  %v836_v33 = vld [vmem:[#allocation5 + $0x38] sm:$0xff]   ;;  %v837_v34 = vld [vmem:[%s1113_s5] sm:$0xff]   ;;  %v838_v36 = vld [vmem:[%s1113_s5 + $0x8] sm:$0xff]  }
  0x33   :  { %v839_v37 = vld [vmem:[%s1113_s5 + $0x10] sm:$0xff]   ;;  %v840_v38 = vld [vmem:[%s1113_s5 + $0x18] sm:$0xff]   ;;  %v841_v39 = vld [vmem:[%s1113_s5 + $0x20] sm:$0xff]  }
  0x34   :  { %v80_v43 = vld [vmem:[%s1110_s2] sm:$0x3]  ;;  %v842_v61 = vld [vmem:[%s1113_s5 + $0x28] sm:$0xff]   ;;  %v843_v62 = vld [vmem:[%s1113_s5 + $0x30] sm:$0xff]  }
  0x35   :  { %185 = vmatpush1.bf16.msra.mxu0 %v807_v8  ;;  %711 = vmatpush3.bf16.msra.mxu1 %v826_v19  ;;  %v85_v45 = vrot.slane %v80_v43, %v84_v42  ;;  %v89_v46 = vrot.slane %v80_v43, %v88_v44  ;;  %v844_v63 = vld [vmem:[%s1113_s5 + $0x38] sm:$0xff]   ;;  %v845_v0 = vld [vmem:[%s1115_s7] sm:$0xff]   ;;  %v846_v1 = vld [vmem:[%s1115_s7 + $0x8] sm:$0xff]  }
  0x36   :  { %186 = vmatprep.subr.bf16.mxu0 %v808_v9  ;;  %712 = vmatprep.subr.bf16.mxu1 %v827_v20  ;;  %v847_v2 = vld [vmem:[%s1115_s7 + $0x10] sm:$0xff]   ;;  %v848_v3 = vld [vmem:[%s1115_s7 + $0x18] sm:$0xff]   ;;  %v849_v4 = vld [vmem:[%s1115_s7 + $0x20] sm:$0xff]  }
  0x37   :  { %v850_v5 = vld [vmem:[%s1115_s7 + $0x28] sm:$0xff]   ;;  %v671_v7 = vld [vmem:[%s1112_s4] ss:$0 sm:$0xff]  ;;  %v852_v19 = vld [vmem:[%s1115_s7 + $0x38] sm:$0xff]  }
  0x38   :  { %v688_v20 = vld [vmem:[%s1114_s6] ss:$0 sm:$0xff] }
  0x39   :  { %187 = vmatpush1.bf16.msra.mxu0 %v810_v11  ;;  %713 = vmatpush3.bf16.msra.mxu1 %v828_v23 }
  0x3a   :  { %188 = vmatprep.subr.bf16.mxu0 %v811_v13  ;;  %714 = vmatprep.subr.bf16.mxu1 %v829_v24 }
  0x3d   :  { %189 = vmatpush1.bf16.msra.mxu0 %v813_v17  ;;  %715 = vmatpush3.bf16.msra.mxu1 %v830_v26 }
  0x3e   :  { %190 = vmatprep.subr.bf16.mxu0 %v814_v18  ;;  %716 = vmatprep.subr.bf16.mxu1 %v831_v27  ;;  %v851_v18 = vld [vmem:[%s1115_s7 + $0x30] sm:$0xff]   ;;  %s934_s7 = smov [#allocation7]  }
  0x3f   :  { %s641_s11 = sshll.u32 %s934_s7, 4  ;;  %s642_s11 = int_to_ptr.vmem [resolvable:$true] %s641_s11 }
  0x40   :  { %s897_s6 = scalar_lea.vmem %s642_s11, 256  ;;  %p902_p3 = scmp.lt.s32.totalorder %s642_s11, %s642_s11 }
  0x41   :  { %191 = vmatpush1.bf16.msra.mxu0 %v816_v21  ;;  %717 = vmatpush3.bf16.msra.mxu1 %v832_v29  ;;  %p898_p2 = scmp.ne.s32.totalorder %s642_s11, %s897_s6  ;;  %p903_p4 = scmp.lt.s32.totalorder %s897_s6, %s897_s6 }
  0x42   :  { %192 = vmatprep.subr.bf16.mxu0 %v817_v22  ;;  %718 = vmatprep.subr.bf16.mxu1 %v833_v30  ;;  %v697_v30 = vld [vmem:[%s1116_s8] ss:$0 sm:$0xff] }
  0x43   :  { %p904_p5 = por %p903_p4, %p902_p3 }
  0x45   :  { %193 = vmatpush1.bf16.msra.mxu0 %v819_v25  ;;  %719 = vmatpush3.bf16.msra.mxu1 %v834_v31  ;;  %p905_p6 = pnand %p904_p5, %p898_p2 }
  0x46   :  { %720 = vmatprep.subr.bf16.mxu1 %v835_v32  ;;  %746 = vmatprep.subr.bf16.mxu0 %v932_v35 }
  0x48   :  { %211 = vmatmul.mubr.bf16.vlgmr.msra.gmra.mrb[0].mxu0 %v820_v28 }
  0x49   :  { %721 = vmatpush3.bf16.msra.mxu1 %v836_v33  ;;  %747 = vmatpush3.bf16.msra.mxu0 %v837_v34 }
  0x4a   :  { %766 = vmatprep.subr.bf16.mxu1 %v932_v35  ;;  %748 = vmatprep.subr.bf16.mxu0 %v932_v35 }
  0x4b   :  { %762 = vmatprep.mubr.msk.bf16.mxu0 %vm933_vm0, %v932_v35 }
  0x4d   :  { %749 = vmatpush3.bf16.msra.mxu0 %v838_v36 }
  0x4e   :  { %750 = vmatprep.subr.bf16.mxu0 %v932_v35 }
  0x51   :  { %751 = vmatpush3.bf16.msra.mxu0 %v839_v37 }
  0x52   :  { %752 = vmatprep.subr.bf16.mxu0 %v932_v35 }
  0x55   :  { %753 = vmatpush3.bf16.msra.mxu0 %v840_v38 }
  0x56   :  { %754 = vmatprep.subr.bf16.mxu0 %v932_v35 }
  0x59   :  { %755 = vmatpush3.bf16.msra.mxu0 %v841_v39 }
  0x5a   :  { %756 = vmatprep.subr.bf16.mxu0 %v932_v35 }
  0x5d   :  { %757 = vmatpush3.bf16.msra.mxu0 %v842_v61 }
  0x5e   :  { %758 = vmatprep.subr.bf16.mxu0 %v932_v35 }
  0x61   :  { %759 = vmatpush3.bf16.msra.mxu0 %v843_v62 }
  0x62   :  { %760 = vmatprep.subr.bf16.mxu0 %v932_v35 }
  0x65   :  { %761 = vmatpush3.bf16.msra.mxu0 %v844_v63 }
 0x11b   :  { %v212_v47 = vpop.f32.mrb[0].mxu0 }
 0x11c   :  { %v213_v48 = vadd.f32 %v212_v47, %v85_v45  ;;  %v214_v49 = vpop.f32.mrb[1].mxu0 }
 0x11d   :  { %v215_v50 = vadd.f32 %v214_v49, %v89_v46  ;;  %v216_v51 = vpop.f32.mrb[2].mxu0 }
 0x11e   :  { %v217_v52 = vadd.f32 %v216_v51, %v85_v45  ;;  %v218_v53 = vpop.f32.mrb[3].mxu0  ;;  %v221_v55 = vmax.f32 %v213_v48, 0.0 }
 0x11f   :  { %v219_v54 = vadd.f32 %v218_v53, %v89_v46  ;;  %v222_v57 = vmax.f32 %v215_v50, 0.0 }
 0x120   :  { %v223_v56 = vmax.f32 %v217_v52, 0.0 }
 0x121   :  { %v224_v58 = vmax.f32 %v219_v54, 0.0 }
 0x122   :  { %v258_v59 = vpack.c.bf16 %v223_v56, %v221_v55 }
 0x123   :  { %v259_v60 = vpack.c.bf16 %v224_v58, %v222_v57 }
 0x125   :  { %394 = vmatprep.mubr.bf16.mxu1 %v259_v60 }
 0x126   :  { %395 = vmatmul.mubr.bf16.vlgmr.msra.gmra.mrb[0].mxu1 %v258_v59 }
 0x127   :  { %782 = vmatprep.mubr.msk.bf16.mxu1 %vm933_vm0, %v932_v35  ;;  %767 = vmatpush3.bf16.msra.mxu1 %v845_v0 }
 0x128   :  { %768 = vmatprep.subr.bf16.mxu1 %v932_v35 }
 0x12b   :  { %769 = vmatpush3.bf16.msra.mxu1 %v846_v1 }
 0x12c   :  { %770 = vmatprep.subr.bf16.mxu1 %v932_v35 }
 0x12f   :  { %771 = vmatpush3.bf16.msra.mxu1 %v847_v2 }
 0x130   :  { %772 = vmatprep.subr.bf16.mxu1 %v932_v35 }
 0x133   :  { %773 = vmatpush3.bf16.msra.mxu1 %v848_v3 }
 0x134   :  { %774 = vmatprep.subr.bf16.mxu1 %v932_v35 }
 0x137   :  { %775 = vmatpush3.bf16.msra.mxu1 %v849_v4 }
 0x138   :  { %776 = vmatprep.subr.bf16.mxu1 %v932_v35 }
 0x13b   :  { %777 = vmatpush3.bf16.msra.mxu1 %v850_v5 }
 0x13c   :  { %778 = vmatprep.subr.bf16.mxu1 %v932_v35 }
 0x13f   :  { %779 = vmatpush3.bf16.msra.mxu1 %v851_v18 }
 0x140   :  { %780 = vmatprep.subr.bf16.mxu1 %v932_v35 }
 0x143   :  { %781 = vmatpush3.bf16.msra.mxu1 %v852_v19 }
 0x1f9   :  { %v722_v6 = vpop.f32.mrb[0].mxu1 }
 0x1fa   :  { %v723_v8 = vpop.f32.mrb[1].mxu1 }
 0x1fb   :  { %v724_v9 = vadd.f32 %v723_v8, %v722_v6  ;;  %v725_v10 = vpop.f32.mrb[2].mxu1 }
 0x1fc   :  { %v726_v11 = vpop.f32.mrb[3].mxu1 }
 0x1fd   :  { %v397_v12 = vadd.f32 %v724_v9, %v671_v7  ;;  %v727_v13 = vadd.f32 %v726_v11, %v725_v10 }
 0x1ff   :  { %v400_v14 = vadd.f32 %v727_v13, %v671_v7  ;;  %v403_v15 = vmax.f32 %v397_v12, 0.0 }
 0x201   :  { %v404_v16 = vmax.f32 %v400_v14, 0.0 }
 0x203   :  { %v422_v17 = vpack.c.bf16 %v404_v16, %v403_v15 }
 0x205   :  { %763 = vmatmul.mubr.bf16.vlgmr.msra.gmra.mrb[4].mxu0 %v422_v17 }
 0x2d8   :  { %v511_v21 = vpop.f32.mrb[4].mxu0 }
 0x2d9   :  { %v512_v22 = vadd.f32 %v688_v20, %v511_v21  ;;  %v764_v23 = vpop.f32.mrb[5].mxu0 }
 0x2da   :  { %v514_v24 = vpop.f32.mrb[6].mxu0 }
 0x2db   :  { %v515_v25 = vadd.f32 %v688_v20, %v514_v24  ;;  %v765_v26 = vpop.f32.mrb[7].mxu0  ;;  %v518_v27 = vmax.f32 %v512_v22, 0.0 }
 0x2dd   :  { %v519_v28 = vmax.f32 %v515_v25, 0.0 }
 0x2df   :  { %v537_v29 = vpack.c.bf16 %v519_v28, %v518_v27 }
 0x2e1   :  { %783 = vmatmul.mubr.bf16.vlgmr.msra.gmra.mrb[4].mxu1 %v537_v29 }
 0x3b4   :  { %v626_v31 = vpop.f32.mrb[4].mxu1 }
 0x3b5   :  { %v627_v32 = vadd.f32 %v697_v30, %v626_v31  ;;  %v784_v33 = vpop.f32.mrb[5].mxu1 }
 0x3b6   :  { %v629_v34 = vpop.f32.mrb[6].mxu1 }
 0x3b7   :  { %v630_v35 = vadd.f32 %v697_v30, %v629_v34  ;;  %v785_v36 = vpop.f32.mrb[7].mxu1  ;;  %634 = vst.msk [vmem:[#allocation7] sm:$0xff] %vm633_vm1, %v627_v32 }
 0x3b9   :  { %635 = vst.msk [vmem:[#allocation7 + $0x8] sm:$0xff] %vm633_vm1, %v630_v35 }
 0x3ba   :  { %908 = shalt.err (!%p905_p6)
}
 0x3bb   :  { %s909_s1 = scalar_lea.hbm %s1117_s9, 256 }
 0x3bc   :  { %p910_p7 = scmp.ne.s32.totalorder %s1117_s9, %s909_s1  ;;  %p913_p8 = scmp.lt.u32.totalorder %s909_s1, %s1117_s9 }
 0x3be   :  { %p915_p9 = pnand %p913_p8, %p910_p7 }
 0x3c0   :  { %918 = shalt.err (!%p915_p9)
}
 0x3c1   :  { %647 = dma.vmem_to_hbm [thread:$0]  %s642_s11, 256, %s1117_s9, [#allocation4], %s926_s19, %s926_s19, %s927_s20  }
 0x3c2   :  { %923 = dma.done.wait [#allocation4], 256  }
 0x3c3   :  { %924 = vsyncadd [#allocation4], 4294967040 }
 0x3c4   :  { %651 = vsyncpa [#allocation3], 1 }
 0x3c5   :  { %652 = vsyncpa [#allocation6], 1 }
 0x3c6   :  { %653 = vsyncpa [#allocation4], 1 }

</bundles_post_ra>
